<compile_context>
chip_gen: v7x
topology: tpu7x:2x2x1
jax: 0.10.0
libtpu: 0.0.40
codegen_flags: <defaults>
</compile_context>

<pallas_src>
import functools

import jax
import jax.numpy as jnp
from jax.experimental import pallas as pl
from jax.experimental.pallas import tpu as pltpu


def _round_up(x, m):
    return (x + m - 1) // m * m


# ----------------------------- Pallas kernel -------------------------------
def _fused_gcn_kernel(a_ref, x_ref, w1_ref, b1_ref, w2_ref, b2_ref,
                      o_ref, h_scr, hw_scr, acc_scr, *,
                      tile, fin_pad, hid_pad, out_pad,
                      l1_agg_first, l2_xform_first):
    p = pl.program_id(0)          # 0: layer 1, 1: layer 2
    i = pl.program_id(1)          # output row-tile of A_hat
    k = pl.program_id(2)          # reduction tile over A_hat columns
    nk = pl.num_programs(2)

    @pl.when(k == 0)
    def _zero_acc():
        acc_scr[...] = jnp.zeros_like(acc_scr)

    a = a_ref[...]                # (tile, tile) bf16 A_hat row/col tile

    # ------------------- layer 1: h = relu(A @ x @ W1 + b1) ----------------
    @pl.when(p == 0)
    def _layer1():
        if l1_agg_first:
            # (A @ x) accumulated; W1 applied once at the end (F_in <= hidden).
            acc_scr[:, :fin_pad] += jnp.dot(
                a, x_ref[...], preferred_element_type=jnp.float32)
        else:
            xw = jnp.dot(x_ref[...], w1_ref[...],
                         preferred_element_type=jnp.float32)
            acc_scr[:, :hid_pad] += jnp.dot(
                a, xw.astype(jnp.bfloat16), preferred_element_type=jnp.float32)

        @pl.when(k == nk - 1)
        def _finalize1():
            if l1_agg_first:
                h = jnp.dot(acc_scr[:, :fin_pad].astype(jnp.bfloat16),
                            w1_ref[...], preferred_element_type=jnp.float32)
            else:
                h = acc_scr[:, :hid_pad]
            h = jnp.maximum(h + b1_ref[...], 0.0)
            row0 = pl.multiple_of(i * tile, tile)
            h_scr[pl.ds(row0, tile), :] = h.astype(h_scr.dtype)

    # ------------------- layer 2: out = A @ h @ W2 + b2 --------------------
    @pl.when(p == 1)
    def _layer2():
        row0 = pl.multiple_of(k * tile, tile)
        if l2_xform_first:
            # h @ W2 computed once per k row-tile (on the first row pass) and
            # cached; the N^2-sized matmul then has the small out_pad width.
            @pl.when(i == 0)
            def _cache_hw():
                h_k = h_scr[pl.ds(row0, tile), :]
                hw = jnp.dot(h_k, w2_ref[...],
                             preferred_element_type=jnp.float32)
                hw_scr[pl.ds(row0, tile), :] = hw.astype(hw_scr.dtype)

            hw_k = hw_scr[pl.ds(row0, tile), :]
            acc_scr[:, :out_pad] += jnp.dot(
                a, hw_k, preferred_element_type=jnp.float32)
        else:
            h_k = h_scr[pl.ds(row0, tile), :]
            acc_scr[:, :hid_pad] += jnp.dot(
                a, h_k, preferred_element_type=jnp.float32)

        @pl.when(k == nk - 1)
        def _finalize2():
            if l2_xform_first:
                out = acc_scr[:, :out_pad]
            else:
                out = jnp.dot(acc_scr[:, :hid_pad].astype(jnp.bfloat16),
                              w2_ref[...], preferred_element_type=jnp.float32)
            o_ref[...] = (out + b2_ref[...]).astype(o_ref.dtype)


# ------------------------------ forward (wrapper) ---------------------------
def gcn_forward(params, x, edge_index, num_nodes, *, tile=512):
    a_hat = build_norm_adj(edge_index, num_nodes)       # f32 [N, N]

    n = num_nodes
    f_in = x.shape[1]
    hid = params["w1"].shape[1]
    f_out = params["w2"].shape[1]

    # Lane-dense padding of every feature dim, node dim padded to the tile.
    fin_pad = _round_up(f_in, 128)
    hid_pad = _round_up(hid, 128)
    out_pad = _round_up(f_out, 128)
    tile = min(tile, _round_up(n, 128))
    n_pad = _round_up(n, tile)
    n_tiles = n_pad // tile

    # Per-layer matmul association: put min(F_in, F_out) on the small side of
    # the N^2-sized aggregation matmul.
    l1_agg_first = fin_pad <= hid_pad          # (A @ x) @ W1
    l2_xform_first = out_pad <= hid_pad        # A @ (h @ W2)
    acc_w = max(fin_pad if l1_agg_first else hid_pad,
                out_pad if l2_xform_first else hid_pad)

    bf = jnp.bfloat16
    a16 = jnp.pad(a_hat, ((0, n_pad - n), (0, n_pad - n))).astype(bf)
    x16 = jnp.pad(x, ((0, n_pad - n), (0, fin_pad - f_in))).astype(bf)
    w1 = jnp.pad(params["w1"], ((0, fin_pad - f_in), (0, hid_pad - hid))).astype(bf)
    b1 = jnp.pad(params["b1"], ((0, 0), (0, hid_pad - hid)))
    w2 = jnp.pad(params["w2"], ((0, hid_pad - hid), (0, out_pad - f_out))).astype(bf)
    b2 = jnp.pad(params["b2"], ((0, 0), (0, out_pad - f_out)))

    kernel = functools.partial(
        _fused_gcn_kernel, tile=tile, fin_pad=fin_pad, hid_pad=hid_pad,
        out_pad=out_pad, l1_agg_first=l1_agg_first,
        l2_xform_first=l2_xform_first)

    out_padded = pl.pallas_call(
        kernel,
        out_shape=jax.ShapeDtypeStruct((n_pad, out_pad), jnp.float32),
        grid_spec=pltpu.PrefetchScalarGridSpec(
            num_scalar_prefetch=0,
            grid=(2, n_tiles, n_tiles),
            in_specs=[
                # A_hat row/col tile, streamed once per layer.
                pl.BlockSpec((tile, tile), lambda p, i, k: (i, k)),
                # x row tile (only consumed in phase 0; constant block in
                # phase 1 so it is not re-fetched).
                pl.BlockSpec((tile, fin_pad), lambda p, i, k: ((1 - p) * k, 0)),
                pl.BlockSpec((fin_pad, hid_pad), lambda p, i, k: (0, 0)),  # W1
                pl.BlockSpec((1, hid_pad), lambda p, i, k: (0, 0)),        # b1
                pl.BlockSpec((hid_pad, out_pad), lambda p, i, k: (0, 0)),  # W2
                pl.BlockSpec((1, out_pad), lambda p, i, k: (0, 0)),        # b2
            ],
            # Output tile i is only produced in phase 1; the (p * i) map keeps
            # each output block's visits contiguous so the single HBM
            # writeback per block carries final data.
            out_specs=pl.BlockSpec((tile, out_pad), lambda p, i, k: (p * i, 0)),
            scratch_shapes=[
                pltpu.VMEM((n_pad, hid_pad), jnp.bfloat16),  # resident h
                pltpu.VMEM((n_pad, out_pad), jnp.bfloat16),  # cached h @ W2
                pltpu.VMEM((tile, acc_w), jnp.float32),      # row-tile acc
            ],
        ),
        compiler_params=pltpu.CompilerParams(
            # Row axis is NOT parallel: layer 2 reads the whole h VMEM scratch
            # written by layer 1, so the fused grid must stay on one core.
            dimension_semantics=("arbitrary", "arbitrary", "arbitrary"),
            vmem_limit_bytes=48 * 1024 * 1024,
        ),
    )(a16, x16, w1, b1, w2, b2)

    return out_padded[:n, :f_out]


# ------------------------------- glue (JAX) --------------------------------
def build_norm_adj(edge_index, num_nodes):
    """Dense D^{-1/2}(A + I)D^{-1/2} from a [2, E] int edge_index (src, dst).

    Note: duplicate edges collapse to weight 1 (PyG scatter-adds duplicates);
    a pre-existing explicit self-loop ends up with weight 2 (matches PyG's
    add_self_loops behaviour).  Correct for simple graphs such as the demo.
    """
    src = edge_index[0]
    dst = edge_index[1]
    a = jnp.zeros((num_nodes, num_nodes), jnp.float32)
    a = a.at[dst, src].set(1.0)                        # message flows src -> dst
    a = a + jnp.eye(num_nodes, dtype=jnp.float32)      # self-loops
    deg = jnp.sum(a, axis=1)
    d_inv_sqrt = jax.lax.rsqrt(deg)
    return a * d_inv_sqrt[:, None] * d_inv_sqrt[None, :]


def _glorot(key, shape):
    fan_in, fan_out = shape
    limit = jnp.sqrt(6.0 / (fan_in + fan_out))
    return jax.random.uniform(key, shape, jnp.float32, -limit, limit)


def init_gcn_params(key, num_features, hidden_size, output_size):
    k1, k2 = jax.random.split(key)
    return {
        "w1": _glorot(k1, (num_features, hidden_size)),
        "b1": jnp.zeros((1, hidden_size), jnp.float32),
        "w2": _glorot(k2, (hidden_size, output_size)),
        "b2": jnp.zeros((1, output_size), jnp.float32),
    }


# ------------------------------ references ----------------------------------
def gcn_forward_ref_f32(params, x, edge_index, num_nodes):
    """Pure-f32 reference (original module semantics)."""
    a_hat = build_norm_adj(edge_index, num_nodes)
    h = jnp.maximum(a_hat @ (x @ params["w1"]) + params["b1"], 0.0)
    return a_hat @ (h @ params["w2"]) + params["b2"]


def gcn_forward_ref_mixed(params, x, edge_index, num_nodes):
    """Mirror of the kernel numerics (bf16 matmul operands, f32 accumulation,
    (A@x)@W1 and A@(h@W2) association — valid for F_in <= hidden >= out)."""
    bf = jnp.bfloat16
    f32 = jnp.float32
    a16 = build_norm_adj(edge_index, num_nodes).astype(bf)
    x16 = x.astype(bf)
    w1 = params["w1"].astype(bf)
    w2 = params["w2"].astype(bf)
    ax = jnp.dot(a16, x16, preferred_element_type=f32)
    h = jnp.maximum(
        jnp.dot(ax.astype(bf), w1, preferred_element_type=f32) + params["b1"],
        0.0).astype(bf)
    hw = jnp.dot(h, w2, preferred_element_type=f32).astype(bf)
    return jnp.dot(a16, hw, preferred_element_type=f32) + params["b2"]


# --------------------------------- main -------------------------------------
if __name__ == "__main__":
    num_nodes = 16
    num_features = 8
    hidden_size = 32
    output_size = 4

    key = jax.random.PRNGKey(0)
    k_x, k_p = jax.random.split(key)

    # Node features [N, F].
    x = jax.random.normal(k_x, (num_nodes, num_features), jnp.float32)

    # Deterministic undirected ring graph as edge_index [2, E].
    src = jnp.arange(num_nodes, dtype=jnp.int32)
    dst = (src + 1) % num_nodes
    edge_index = jnp.stack(
        [jnp.concatenate([src, dst]), jnp.concatenate([dst, src])], axis=0
    )

    params = init_gcn_params(k_p, num_features, hidden_size, output_size)

    fwd = jax.jit(functools.partial(gcn_forward, num_nodes=num_nodes))
    out = fwd(params, x, edge_index)
    out = jax.block_until_ready(out)
    assert out.shape == (num_nodes, output_size)

    # Strict check vs a reference that mirrors the kernel's mixed precision.
    ref_mixed = gcn_forward_ref_mixed(params, x, edge_index, num_nodes)
    assert jnp.allclose(out, ref_mixed, atol=1e-4, rtol=1e-4), (
        jnp.max(jnp.abs(out - ref_mixed)))

    # Loose check vs the original pure-f32 module semantics (bf16 operands).
    ref_f32 = gcn_forward_ref_f32(params, x, edge_index, num_nodes)
    assert jnp.allclose(out, ref_f32, atol=5e-2, rtol=5e-2), (
        jnp.max(jnp.abs(out - ref_f32)))

    print("KERNEL_OK")
</pallas_src>

<mosaic_0001>
module attributes {stable_mosaic.version = 11 : i64} {
  func.func @_fused_gcn_kernel(%arg0: i32, %arg1: i32, %arg2: i32, %arg3: memref<128x128xbf16, #tpu.memory_space<vmem>>, %arg4: memref<128x128xbf16, #tpu.memory_space<vmem>>, %arg5: memref<128x128xbf16, #tpu.memory_space<vmem>>, %arg6: memref<1x128xf32, #tpu.memory_space<vmem>>, %arg7: memref<128x128xbf16, #tpu.memory_space<vmem>>, %arg8: memref<1x128xf32, #tpu.memory_space<vmem>>, %arg9: memref<128x128xf32, #tpu.memory_space<vmem>>, %arg10: memref<128x128xbf16, #tpu.memory_space<vmem>>, %arg11: memref<128x128xbf16, #tpu.memory_space<vmem>>, %arg12: memref<128x128xf32, #tpu.memory_space<vmem>>) attributes {dimension_semantics = [#tpu.dimension_semantics<arbitrary>, #tpu.dimension_semantics<arbitrary>, #tpu.dimension_semantics<arbitrary>], iteration_bounds = array<i64: 2, 1, 1>, scalar_prefetch = 0 : i64, scratch_operands = 3 : i64, tpu.core_type = #tpu.core_type<tc>, window_params = [{transform_indices = @transform_0, window_bounds = array<i64: 128, 128>}, {transform_indices = @transform_1, window_bounds = array<i64: 128, 128>}, {pipeline_mode = #tpu.pipeline_mode<synchronous>, transform_indices = @transform_2, window_bounds = array<i64: 128, 128>}, {pipeline_mode = #tpu.pipeline_mode<synchronous>, transform_indices = @transform_3, window_bounds = array<i64: 1, 128>}, {pipeline_mode = #tpu.pipeline_mode<synchronous>, transform_indices = @transform_4, window_bounds = array<i64: 128, 128>}, {pipeline_mode = #tpu.pipeline_mode<synchronous>, transform_indices = @transform_5, window_bounds = array<i64: 1, 128>}, {transform_indices = @transform_6, window_bounds = array<i64: 128, 128>}]} {
    %c0_i32 = arith.constant 0 : i32
    %0 = arith.cmpi eq, %arg2, %c0_i32 : i32
    %1 = arith.extui %0 : i1 to i32
    %c0_i32_0 = arith.constant 0 : i32
    %2 = arith.cmpi ne, %1, %c0_i32_0 : i32
    scf.if %2 {
      %cst = arith.constant 0.000000e+00 : f32
      %10 = vector.broadcast %cst : f32 to vector<128x128xf32>
      %c0_5 = arith.constant 0 : index
      %c0_6 = arith.constant 0 : index
      %11 = vector.load %arg12[%c0_5, %c0_6] : memref<128x128xf32, #tpu.memory_space<vmem>>, vector<128x128xf32>
      tpu.vector_store %arg12[%c0_5, %c0_6], %10 {strides = array<i32>} : memref<128x128xf32, #tpu.memory_space<vmem>>, vector<128x128xf32>,
    } else {
    }
    %c0 = arith.constant 0 : index
    %c0_1 = arith.constant 0 : index
    %3 = vector.load %arg3[%c0, %c0_1] : memref<128x128xbf16, #tpu.memory_space<vmem>>, vector<128x128xbf16>
    %c0_i32_2 = arith.constant 0 : i32
    %4 = arith.cmpi eq, %arg0, %c0_i32_2 : i32
    %5 = arith.extui %4 : i1 to i32
    %c0_i32_3 = arith.constant 0 : i32
    %6 = arith.cmpi ne, %5, %c0_i32_3 : i32
    scf.if %6 {
      %c0_5 = arith.constant 0 : index
      %c0_6 = arith.constant 0 : index
      %10 = vector.load %arg12[%c0_5, %c0_6] : memref<128x128xf32, #tpu.memory_space<vmem>>, vector<128x128xf32>
      %c0_7 = arith.constant 0 : index
      %c0_8 = arith.constant 0 : index
      %11 = vector.load %arg4[%c0_7, %c0_8] : memref<128x128xbf16, #tpu.memory_space<vmem>>, vector<128x128xbf16>
      %cst = arith.constant dense<0.000000e+00> : vector<128x128xf32>
      %12 = tpu.matmul %3, %11, %cst {dimension_numbers = #tpu.dot_dimension_numbers<[1], [0], [0], [1], [0, 0, 1, 1], [], []>} : vector<128x128xbf16>, vector<128x128xbf16>, vector<128x128xf32> -> vector<128x128xf32>
      %13 = arith.addf %10, %12 : vector<128x128xf32>
      %c0_9 = arith.constant 0 : index
      %c0_10 = arith.constant 0 : index
      %14 = vector.load %arg12[%c0_9, %c0_10] : memref<128x128xf32, #tpu.memory_space<vmem>>, vector<128x128xf32>
      tpu.vector_store %arg12[%c0_9, %c0_10], %13 {strides = array<i32>} : memref<128x128xf32, #tpu.memory_space<vmem>>, vector<128x128xf32>,
      %c0_i32_11 = arith.constant 0 : i32
      %15 = arith.cmpi eq, %arg2, %c0_i32_11 : i32
      %16 = arith.extui %15 : i1 to i32
      %c0_i32_12 = arith.constant 0 : i32
      %17 = arith.cmpi ne, %16, %c0_i32_12 : i32
      scf.if %17 {
        %c0_13 = arith.constant 0 : index
        %c0_14 = arith.constant 0 : index
        %18 = vector.load %arg12[%c0_13, %c0_14] : memref<128x128xf32, #tpu.memory_space<vmem>>, vector<128x128xf32>
        %19 = arith.truncf %18 : vector<128x128xf32> to vector<128x128xbf16>
        %c0_15 = arith.constant 0 : index
        %c0_16 = arith.constant 0 : index
        %20 = vector.load %arg5[%c0_15, %c0_16] : memref<128x128xbf16, #tpu.memory_space<vmem>>, vector<128x128xbf16>
        %cst_17 = arith.constant dense<0.000000e+00> : vector<128x128xf32>
        %21 = tpu.matmul %19, %20, %cst_17 {dimension_numbers = #tpu.dot_dimension_numbers<[1], [0], [0], [1], [0, 0, 1, 1], [], []>} : vector<128x128xbf16>, vector<128x128xbf16>, vector<128x128xf32> -> vector<128x128xf32>
        %c0_18 = arith.constant 0 : index
        %c0_19 = arith.constant 0 : index
        %22 = vector.load %arg6[%c0_18, %c0_19] : memref<1x128xf32, #tpu.memory_space<vmem>>, vector<1x128xf32>
        %23 = vector.broadcast %22 : vector<1x128xf32> to vector<128x128xf32>
        %24 = arith.addf %21, %23 : vector<128x128xf32>
        %cst_20 = arith.constant 0.000000e+00 : f32
        %25 = vector.broadcast %cst_20 : f32 to vector<128x128xf32>
        %26 = arith.maximumf %24, %25 : vector<128x128xf32>
        %c128_i32 = arith.constant 128 : i32
        %27 = arith.muli %arg1, %c128_i32 : i32
        %28 = tpu.assume_multiple %27, 128 : i32
        %29 = arith.truncf %26 : vector<128x128xf32> to vector<128x128xbf16>
        %30 = arith.index_cast %28 : i32 to index
        %c0_21 = arith.constant 0 : index
        %31 = vector.load %arg10[%30, %c0_21] : memref<128x128xbf16, #tpu.memory_space<vmem>>, vector<128x128xbf16>
        tpu.vector_store %arg10[%30, %c0_21], %29 {strides = array<i32>} : memref<128x128xbf16, #tpu.memory_space<vmem>>, vector<128x128xbf16>,
      } else {
      }
    } else {
    }
    %c1_i32 = arith.constant 1 : i32
    %7 = arith.cmpi eq, %arg0, %c1_i32 : i32
    %8 = arith.extui %7 : i1 to i32
    %c0_i32_4 = arith.constant 0 : i32
    %9 = arith.cmpi ne, %8, %c0_i32_4 : i32
    scf.if %9 {
      %c128_i32 = arith.constant 128 : i32
      %10 = arith.muli %arg2, %c128_i32 : i32
      %11 = tpu.assume_multiple %10, 128 : i32
      %c0_i32_5 = arith.constant 0 : i32
      %12 = arith.cmpi eq, %arg1, %c0_i32_5 : i32
      %13 = arith.extui %12 : i1 to i32
      %c0_i32_6 = arith.constant 0 : i32
      %14 = arith.cmpi ne, %13, %c0_i32_6 : i32
      scf.if %14 {
        %24 = arith.index_cast %11 : i32 to index
        %c0_14 = arith.constant 0 : index
        %25 = vector.load %arg10[%24, %c0_14] : memref<128x128xbf16, #tpu.memory_space<vmem>>, vector<128x128xbf16>
        %c0_15 = arith.constant 0 : index
        %c0_16 = arith.constant 0 : index
        %26 = vector.load %arg7[%c0_15, %c0_16] : memref<128x128xbf16, #tpu.memory_space<vmem>>, vector<128x128xbf16>
        %cst_17 = arith.constant dense<0.000000e+00> : vector<128x128xf32>
        %27 = tpu.matmul %25, %26, %cst_17 {dimension_numbers = #tpu.dot_dimension_numbers<[1], [0], [0], [1], [0, 0, 1, 1], [], []>} : vector<128x128xbf16>, vector<128x128xbf16>, vector<128x128xf32> -> vector<128x128xf32>
        %28 = arith.truncf %27 : vector<128x128xf32> to vector<128x128xbf16>
        %29 = arith.index_cast %11 : i32 to index
        %c0_18 = arith.constant 0 : index
        %30 = vector.load %arg11[%29, %c0_18] : memref<128x128xbf16, #tpu.memory_space<vmem>>, vector<128x128xbf16>
        tpu.vector_store %arg11[%29, %c0_18], %28 {strides = array<i32>} : memref<128x128xbf16, #tpu.memory_space<vmem>>, vector<128x128xbf16>,
      } else {
      }
      %15 = arith.index_cast %11 : i32 to index
      %c0_7 = arith.constant 0 : index
      %16 = vector.load %arg11[%15, %c0_7] : memref<128x128xbf16, #tpu.memory_space<vmem>>, vector<128x128xbf16>
      %c0_8 = arith.constant 0 : index
      %c0_9 = arith.constant 0 : index
      %17 = vector.load %arg12[%c0_8, %c0_9] : memref<128x128xf32, #tpu.memory_space<vmem>>, vector<128x128xf32>
      %cst = arith.constant dense<0.000000e+00> : vector<128x128xf32>
      %18 = tpu.matmul %3, %16, %cst {dimension_numbers = #tpu.dot_dimension_numbers<[1], [0], [0], [1], [0, 0, 1, 1], [], []>} : vector<128x128xbf16>, vector<128x128xbf16>, vector<128x128xf32> -> vector<128x128xf32>
      %19 = arith.addf %17, %18 : vector<128x128xf32>
      %c0_10 = arith.constant 0 : index
      %c0_11 = arith.constant 0 : index
      %20 = vector.load %arg12[%c0_10, %c0_11] : memref<128x128xf32, #tpu.memory_space<vmem>>, vector<128x128xf32>
      tpu.vector_store %arg12[%c0_10, %c0_11], %19 {strides = array<i32>} : memref<128x128xf32, #tpu.memory_space<vmem>>, vector<128x128xf32>,
      %c0_i32_12 = arith.constant 0 : i32
      %21 = arith.cmpi eq, %arg2, %c0_i32_12 : i32
      %22 = arith.extui %21 : i1 to i32
      %c0_i32_13 = arith.constant 0 : i32
      %23 = arith.cmpi ne, %22, %c0_i32_13 : i32
      scf.if %23 {
        %c0_14 = arith.constant 0 : index
        %c0_15 = arith.constant 0 : index
        %24 = vector.load %arg12[%c0_14, %c0_15] : memref<128x128xf32, #tpu.memory_space<vmem>>, vector<128x128xf32>
        %c0_16 = arith.constant 0 : index
        %c0_17 = arith.constant 0 : index
        %25 = vector.load %arg8[%c0_16, %c0_17] : memref<1x128xf32, #tpu.memory_space<vmem>>, vector<1x128xf32>
        %26 = vector.broadcast %25 : vector<1x128xf32> to vector<128x128xf32>
        %27 = arith.addf %24, %26 : vector<128x128xf32>
        %c0_18 = arith.constant 0 : index
        %c0_19 = arith.constant 0 : index
        %28 = vector.load %arg9[%c0_18, %c0_19] : memref<128x128xf32, #tpu.memory_space<vmem>>, vector<128x128xf32>
        tpu.vector_store %arg9[%c0_18, %c0_19], %27 {strides = array<i32>} : memref<128x128xf32, #tpu.memory_space<vmem>>, vector<128x128xf32>,
      } else {
      }
    } else {
    }
    return
  }
  func.func @transform_0(%arg0: i32, %arg1: i32, %arg2: i32) -> (i32, i32) {
    %c0_i32 = arith.constant 0 : i32
    return %arg1, %arg2 : i32, i32
  }
  func.func @transform_1(%arg0: i32, %arg1: i32, %arg2: i32) -> (i32, i32) {
    %c1_i32 = arith.constant 1 : i32
    %0 = arith.subi %c1_i32, %arg0 : i32
    %1 = arith.muli %0, %arg2 : i32
    %c0_i32 = arith.constant 0 : i32
    %c0_i32_0 = arith.constant 0 : i32
    return %1, %c0_i32 : i32, i32
  }
  func.func @transform_2(%arg0: i32, %arg1: i32, %arg2: i32) -> (i32, i32) {
    %c0_i32 = arith.constant 0 : i32
    %c0_i32_0 = arith.constant 0 : i32
    %c0_i32_1 = arith.constant 0 : i32
    return %c0_i32, %c0_i32_0 : i32, i32
  }
  func.func @transform_3(%arg0: i32, %arg1: i32, %arg2: i32) -> (i32, i32) {
    %c0_i32 = arith.constant 0 : i32
    %c0_i32_0 = arith.constant 0 : i32
    %c0_i32_1 = arith.constant 0 : i32
    return %c0_i32, %c0_i32_0 : i32, i32
  }
  func.func @transform_4(%arg0: i32, %arg1: i32, %arg2: i32) -> (i32, i32) {
    %c0_i32 = arith.constant 0 : i32
    %c0_i32_0 = arith.constant 0 : i32
    %c0_i32_1 = arith.constant 0 : i32
    return %c0_i32, %c0_i32_0 : i32, i32
  }
  func.func @transform_5(%arg0: i32, %arg1: i32, %arg2: i32) -> (i32, i32) {
    %c0_i32 = arith.constant 0 : i32
    %c0_i32_0 = arith.constant 0 : i32
    %c0_i32_1 = arith.constant 0 : i32
    return %c0_i32, %c0_i32_0 : i32, i32
  }
  func.func @transform_6(%arg0: i32, %arg1: i32, %arg2: i32) -> (i32, i32) {
    %0 = arith.muli %arg0, %arg1 : i32
    %c0_i32 = arith.constant 0 : i32
    %c0_i32_0 = arith.constant 0 : i32
    return %0, %c0_i32 : i32, i32
  }
}

</mosaic_0001>

<bundles_post_ra>
// kernel: gcn_forward.1
= control target key start
LH: loop header
LB: loop body
LE: loop exit
PB: predicated region body
PF: predicated region fallthrough
CT: control target
= control target key end

     0   :  { %s1772_s21 = smov 0   ;;  %s1774_s22 = smov 0   ;;  %s2059_s0 = inlined_call_operand.vmem [shape: bf16[128,128], index: 0, kind: input, shape index: {}]   ;;  %s2060_s1 = inlined_call_operand.vmem [shape: bf16[128,128], index: 1, kind: input, shape index: {}]   ;;  %s2061_s2 = inlined_call_operand.vmem [shape: bf16[128,128], index: 2, kind: input, shape index: {}]   ;;  %s2062_s3 = inlined_call_operand.vmem [shape: f32[1,128], index: 3, kind: input, shape index: {}]   ;;  %s2063_s4 = inlined_call_operand.vmem [shape: bf16[128,128], index: 4, kind: input, shape index: {}]   ;;  %s2064_s5 = inlined_call_operand.vmem [shape: f32[1,128], index: 5, kind: input, shape index: {}]   ;;  %s2065_s6 = inlined_call_operand.vmem [shape: f32[128,128], index: 6, kind: output, shape index: {}]  }
   0x1   :  { %s1776_s23 = smov 0  }
   0x2 LB: > { %s35_s24 = sadd.s32 1, %s1730_s22  ;;  %p1422_p0 = scmp.ge.s32.totalorder %s1734_s23, 1  ;;  %s1734_s23 = sphi %s1776_s23, %s16_s23   ;;  %s1730_s22 = sphi %s1774_s22, %s2067_s22   ;;  %s1726_s21 = sphi %s1772_s21, %s2066_s21  }
   0x3   : > { %p37_p1 = scmp.ge.s32.totalorder %s35_s24, 2  ;;  %p258_p2 = scmp.lt.s32.totalorder %s1734_s23, 3 }
   0x5   : > { %s2069_s24 = smov (%p37_p1, %s35_s24), 0  ;;  %p259_p3 = pnand %p1422_p0, %p258_p2 }
   0x6   : > { %v1795_v0 = vld [vmem:[%s2059_s0] sm:$0xf] (!%p259_p3)  ;;  %v1800_v1 = vld [vmem:[%s2059_s0 + $0x4] sm:$0xf] (!%p259_p3)  ;;  %v1736_v2 = vmov (!%p259_p3), 0.0   ;;  %p1423_p4 = scmp.ne.s32.totalorder (!%p259_p3), %s1726_s21, 0 }
   0x7   : > { %262 = sbr.rel (%p259_p3) target bundleno = 1040 (0x410), region = 44  ;;  %331 = vst [vmem:[#allocation4] sm:$0xff] (!%p259_p3), %v1736_v2  ;;  %332 = vst [vmem:[#allocation4 + $0x8] sm:$0xff] (!%p259_p3), %v1736_v2  ;;  %v1805_v3 = vld [vmem:[%s2059_s0 + $0x8] sm:$0xf] (!%p259_p3) }
   0x8   : > { %333 = vst [vmem:[#allocation4 + $0x10] sm:$0xff] (!%p259_p3), %v1736_v2  ;;  %334 = vst [vmem:[#allocation4 + $0x18] sm:$0xff] (!%p259_p3), %v1736_v2  ;;  %v1810_v4 = vld [vmem:[%s2059_s0 + $0xc] sm:$0xf] (!%p259_p3)  ;;  %v1815_v5 = vld [vmem:[%s2059_s0 + $0x10] sm:$0xf] (!%p259_p3) }
   0x9   : > { %335 = vst [vmem:[#allocation4 + $0x20] sm:$0xff] (!%p259_p3), %v1736_v2  ;;  %336 = vst [vmem:[#allocation4 + $0x28] sm:$0xff] (!%p259_p3), %v1736_v2  ;;  %v1820_v6 = vld [vmem:[%s2059_s0 + $0x14] sm:$0xf] (!%p259_p3)  ;;  %v1825_v7 = vld [vmem:[%s2059_s0 + $0x18] sm:$0xf] (!%p259_p3) }
   0xa   : > { %337 = vst [vmem:[#allocation4 + $0x30] sm:$0xff] (!%p259_p3), %v1736_v2  ;;  %338 = vst [vmem:[#allocation4 + $0x38] sm:$0xff] (!%p259_p3), %v1736_v2  ;;  %v1830_v8 = vld [vmem:[%s2059_s0 + $0x1c] sm:$0xf] (!%p259_p3)  ;;  %v1835_v9 = vld [vmem:[%s2059_s0 + $0x20] sm:$0xf] (!%p259_p3) }
   0xb   : > { %339 = vst [vmem:[#allocation4 + $0x40] sm:$0xff] (!%p259_p3), %v1736_v2  ;;  %340 = vst [vmem:[#allocation4 + $0x48] sm:$0xff] (!%p259_p3), %v1736_v2  ;;  %v1840_v10 = vld [vmem:[%s2059_s0 + $0x24] sm:$0xf] (!%p259_p3)  ;;  %v1845_v11 = vld [vmem:[%s2059_s0 + $0x28] sm:$0xf] (!%p259_p3) }
   0xc   : > { %341 = vst [vmem:[#allocation4 + $0x50] sm:$0xff] (!%p259_p3), %v1736_v2  ;;  %342 = vst [vmem:[#allocation4 + $0x58] sm:$0xff] (!%p259_p3), %v1736_v2  ;;  %v1850_v12 = vld [vmem:[%s2059_s0 + $0x2c] sm:$0xf] (!%p259_p3)  ;;  %v1855_v13 = vld [vmem:[%s2059_s0 + $0x30] sm:$0xf] (!%p259_p3) }
   0xd   : > { %343 = vst [vmem:[#allocation4 + $0x60] sm:$0xff] (!%p259_p3), %v1736_v2  ;;  %344 = vst [vmem:[#allocation4 + $0x68] sm:$0xff] (!%p259_p3), %v1736_v2  ;;  %v1860_v14 = vld [vmem:[%s2059_s0 + $0x34] sm:$0xf] (!%p259_p3)  ;;  %v1865_v15 = vld [vmem:[%s2059_s0 + $0x38] sm:$0xf] (!%p259_p3) }
   0xe   : > { %345 = vst [vmem:[#allocation4 + $0x70] sm:$0xff] %v1736_v2  ;;  %346 = vst [vmem:[#allocation4 + $0x78] sm:$0xff] %v1736_v2  ;;  %v1870_v16 = vld [vmem:[%s2059_s0 + $0x3c] sm:$0xf]  ;;  %366 = sbr.rel (%p1423_p4) target bundleno = 513 (0x201), region = 52  ;;  %v1688_v17 = vld [vmem:[%s2060_s1] sm:$0xff] (!%p1423_p4)   ;;  %v1424_v18 = vcombine.low (!%p1423_p4), %v1795_v0, %v1800_v1  ;;  %v1425_v30 = vcombine.low (!%p1423_p4), %v1805_v3, %v1810_v4  ;;  %v1426_v31 = vcombine.low (!%p1423_p4), %v1815_v5, %v1820_v6 }
   0xf   : > { %v1689_v19 = vld [vmem:[%s2060_s1 + $0x8] sm:$0xff] (!%p1423_p4)   ;;  %1535 = vmatprep.subr.bf16.mxu0 (!%p1423_p4), %v1688_v17  ;;  %v1690_v20 = vld [vmem:[%s2060_s1 + $0x10] sm:$0xff] (!%p1423_p4)   ;;  %v1691_v21 = vld [vmem:[%s2060_s1 + $0x18] sm:$0xff] (!%p1423_p4)   ;;  %v1427_v32 = vcombine.low (!%p1423_p4), %v1825_v7, %v1830_v8  ;;  %v1428_v33 = vcombine.low (!%p1423_p4), %v1835_v9, %v1840_v10  ;;  %v1429_v34 = vcombine.low (!%p1423_p4), %v1845_v11, %v1850_v12  ;;  %v1430_v35 = vcombine.low (!%p1423_p4), %v1855_v13, %v1860_v14 }
  0x10   : > { %1551 = vmatprep.mubr.bf16.mxu0 (!%p1423_p4), %v1424_v18  ;;  %1536 = vmatpush3.bf16.msra.mxu0 (!%p1423_p4), %v1688_v17  ;;  %v1696_v22 = vld [vmem:[%s2061_s2] sm:$0xff] (!%p1423_p4)   ;;  %v1697_v23 = vld [vmem:[%s2061_s2 + $0x8] sm:$0xff] (!%p1423_p4)   ;;  %v1698_v25 = vld [vmem:[%s2061_s2 + $0x10] sm:$0xff] (!%p1423_p4)   ;;  %v1431_v36 = vcombine.low (!%p1423_p4), %v1865_v15, %v1870_v16 }
  0x11   : > { %1537 = vmatprep.subr.bf16.mxu0 (!%p1423_p4), %v1689_v19  ;;  %1567 = vmatprep.subr.bf16.mxu1 (!%p1423_p4), %v1696_v22  ;;  %v1692_v24 = vld [vmem:[%s2060_s1 + $0x20] sm:$0xff] (!%p1423_p4)   ;;  %v1693_v26 = vld [vmem:[%s2060_s1 + $0x28] sm:$0xff] (!%p1423_p4)   ;;  %v1699_v27 = vld [vmem:[%s2061_s2 + $0x18] sm:$0xff] (!%p1423_p4)  }
  0x12   : > { %1568 = vmatpush3.bf16.msra.mxu1 (!%p1423_p4), %v1696_v22  ;;  %v1694_v28 = vld [vmem:[%s2060_s1 + $0x30] sm:$0xff] (!%p1423_p4)   ;;  %v1695_v29 = vld [vmem:[%s2060_s1 + $0x38] sm:$0xff] (!%p1423_p4)   ;;  %v1700_v37 = vld [vmem:[%s2061_s2 + $0x20] sm:$0xff] (!%p1423_p4)  }
  0x13   : > { %1569 = vmatprep.subr.bf16.mxu1 (!%p1423_p4), %v1697_v23  ;;  %v1701_v38 = vld [vmem:[%s2061_s2 + $0x28] sm:$0xff] (!%p1423_p4)   ;;  %v1702_v39 = vld [vmem:[%s2061_s2 + $0x30] sm:$0xff] (!%p1423_p4)   ;;  %v1703_v40 = vld [vmem:[%s2061_s2 + $0x38] sm:$0xff] (!%p1423_p4)  }
  0x14   : > { %1538 = vmatpush3.bf16.msra.mxu0 (!%p1423_p4), %v1689_v19  ;;  %v369_v41 = vld [vmem:[#allocation4 + $0x10] sm:$0xff] (!%p1423_p4)  ;;  %v367_v42 = vld [vmem:[#allocation4] sm:$0xff] (!%p1423_p4)  ;;  %v370_v44 = vld [vmem:[#allocation4 + $0x18] sm:$0xff] (!%p1423_p4) }
  0x15   : > { %1539 = vmatprep.subr.bf16.mxu0 %v1690_v20  ;;  %v368_v47 = vld [vmem:[#allocation4 + $0x8] sm:$0xff]  ;;  %v373_v54 = vld [vmem:[#allocation4 + $0x30] sm:$0xff]  ;;  %v371_v56 = vld [vmem:[#allocation4 + $0x20] sm:$0xff] }
  0x16   : > { %1570 = vmatpush3.bf16.msra.mxu1 %v1697_v23  ;;  %v374_v58 = vld [vmem:[#allocation4 + $0x38] sm:$0xff]  ;;  %v372_v61 = vld [vmem:[#allocation4 + $0x28] sm:$0xff]  ;;  %v375_v22 = vld [vmem:[#allocation4 + $0x40] sm:$0xff] }
  0x17   : > { %1571 = vmatprep.subr.bf16.mxu1 %v1698_v25 }
  0x18   : > { %1540 = vmatpush3.bf16.msra.mxu0 %v1690_v20  ;;  %v377_v20 = vld [vmem:[#allocation4 + $0x50] sm:$0xff] }
  0x19   : > { %1541 = vmatprep.subr.bf16.mxu0 %v1691_v21 }
  0x1a   : > { %1572 = vmatpush3.bf16.msra.mxu1 %v1698_v25 }
  0x1b   : > { %1573 = vmatprep.subr.bf16.mxu1 %v1699_v27 }
  0x1c   : > { %1542 = vmatpush3.bf16.msra.mxu0 %v1691_v21 }
  0x1d   : > { %1543 = vmatprep.subr.bf16.mxu0 %v1692_v24 }
  0x1e   : > { %1574 = vmatpush3.bf16.msra.mxu1 %v1699_v27  ;;  %v376_v27 = vld [vmem:[#allocation4 + $0x48] sm:$0xff] }
  0x1f   : > { %1575 = vmatprep.subr.bf16.mxu1 %v1700_v37 }
  0x20   : > { %1544 = vmatpush3.bf16.msra.mxu0 %v1692_v24  ;;  %v378_v24 = vld [vmem:[#allocation4 + $0x58] sm:$0xff] }
  0x21   : > { %1545 = vmatprep.subr.bf16.mxu0 %v1693_v26 }
  0x22   : > { %1576 = vmatpush3.bf16.msra.mxu1 %v1700_v37 }
  0x23   : > { %1577 = vmatprep.subr.bf16.mxu1 %v1701_v38 }
  0x24   : > { %1546 = vmatpush3.bf16.msra.mxu0 %v1693_v26 }
  0x25   : > { %1547 = vmatprep.subr.bf16.mxu0 %v1694_v28 }
  0x26   : > { %1578 = vmatpush3.bf16.msra.mxu1 %v1701_v38  ;;  %v382_v38 = vld [vmem:[#allocation4 + $0x78] sm:$0xff] }
  0x27   : > { %1579 = vmatprep.subr.bf16.mxu1 %v1702_v39 }
  0x28   : > { %1548 = vmatpush3.bf16.msra.mxu0 %v1694_v28 }
  0x29   : > { %1549 = vmatprep.subr.bf16.mxu0 %v1695_v29 }
  0x2a   : > { %1580 = vmatpush3.bf16.msra.mxu1 %v1702_v39 }
  0x2b   : > { %1581 = vmatprep.subr.bf16.mxu1 %v1703_v40 }
  0x2c   : > { %1550 = vmatpush3.bf16.msra.mxu0 %v1695_v29 }
  0x2e   : > { %1582 = vmatpush3.bf16.msra.mxu1 %v1703_v40 }
  0x2f   : > { %1552 = vmatmul.mubr.bf16.vlgmr.msra.gmra.mrb[0].mxu0 %v1425_v30 }
  0x30   : > { %1555 = vmatprep.mubr.bf16.mxu0 %v1426_v31 }
  0x37   : > { %1556 = vmatmul.mubr.bf16.gmra.mrb[4].mxu0 %v1427_v32 }
  0x38   : > { %1559 = vmatprep.mubr.bf16.mxu0 %v1428_v33 }
  0x3f   : > { %1560 = vmatmul.mubr.bf16.gmra.mrb[8].mxu0 %v1429_v34  ;;  %v381_v34 = vld [vmem:[#allocation4 + $0x70] sm:$0xff] }
  0x40   : > { %1563 = vmatprep.mubr.bf16.mxu0 %v1430_v35 }
  0x47   : > { %1564 = vmatmul.mubr.bf16.gmra.mrb[12].mxu0 %v1431_v36  ;;  %v379_v36 = vld [vmem:[#allocation4 + $0x60] sm:$0xff] }
 0x102   : > { %v1553_v43 = vpop.f32.mrb[0].mxu0 }
 0x103   : > { %v594_v45 = vadd.f32 %v1553_v43, %v369_v41  ;;  %v529_v46 = vpop.f32.mrb[1].mxu0  ;;  %v380_v41 = vld [vmem:[#allocation4 + $0x68] sm:$0xff] }
 0x104   : > { %v592_v48 = vadd.f32 %v529_v46, %v367_v42  ;;  %v1554_v49 = vpop.f32.mrb[2].mxu0 }
 0x105   : > { %610 = vst [vmem:[#allocation4 + $0x10] sm:$0xff] %v594_v45  ;;  %v595_v50 = vadd.f32 %v1554_v49, %v370_v44  ;;  %v532_v51 = vpop.f32.mrb[3].mxu0  ;;  %v1440_v49 = vld [vmem:[%s2062_s3] ss:$0 sm:$0xff] }
 0x106   : > { %608 = vst [vmem:[#allocation4] sm:$0xff] %v592_v48  ;;  %v593_v52 = vadd.f32 %v532_v51, %v368_v47 }
 0x107   : > { %611 = vst [vmem:[#allocation4 + $0x18] sm:$0xff] %v595_v50  ;;  %v644_v53 = vpack.c.bf16 %v595_v50, %v594_v45 }
 0x108   : > { %609 = vst [vmem:[#allocation4 + $0x8] sm:$0xff] %v593_v52  ;;  %v643_v55 = vpack.c.bf16 %v593_v52, %v592_v48 }
 0x10a   : > { %v1557_v57 = vpop.f32.mrb[4].mxu0  ;;  %1583 = vmatprep.mubr.bf16.mxu1 %v643_v55 }
 0x10b   : > { %v598_v59 = vadd.f32 %v1557_v57, %v373_v54  ;;  %v545_v60 = vpop.f32.mrb[5].mxu0  ;;  %1584 = vmatmul.mubr.bf16.vlgmr.msra.gmra.mrb[0].mxu1 %v644_v53 }
 0x10c   : > { %v596_v62 = vadd.f32 %v545_v60, %v371_v56  ;;  %v1558_v63 = vpop.f32.mrb[6].mxu0 }
 0x10d   : > { %614 = vst [vmem:[#allocation4 + $0x30] sm:$0xff] %v598_v59  ;;  %v599_v2 = vadd.f32 %v1558_v63, %v374_v58  ;;  %v548_v17 = vpop.f32.mrb[7].mxu0 }
 0x10e   : > { %612 = vst [vmem:[#allocation4 + $0x20] sm:$0xff] %v596_v62  ;;  %v597_v18 = vadd.f32 %v548_v17, %v372_v61 }
 0x10f   : > { %615 = vst [vmem:[#allocation4 + $0x38] sm:$0xff] %v599_v2  ;;  %v646_v19 = vpack.c.bf16 %v599_v2, %v598_v59 }
 0x110   : > { %613 = vst [vmem:[#allocation4 + $0x28] sm:$0xff] %v597_v18  ;;  %v645_v21 = vpack.c.bf16 %v597_v18, %v596_v62 }
 0x112   : > { %v1561_v23 = vpop.f32.mrb[8].mxu0  ;;  %1587 = vmatprep.mubr.bf16.mxu1 %v645_v21 }
 0x113   : > { %v602_v25 = vadd.f32 %v1561_v23, %v377_v20  ;;  %v561_v26 = vpop.f32.mrb[9].mxu0  ;;  %1588 = vmatmul.mubr.bf16.gmra.mrb[4].mxu1 %v646_v19 }
 0x114   : > { %v600_v28 = vadd.f32 %v561_v26, %v375_v22  ;;  %v1562_v29 = vpop.f32.mrb[10].mxu0 }
 0x115   : > { %618 = vst [vmem:[#allocation4 + $0x50] sm:$0xff] %v602_v25  ;;  %v603_v30 = vadd.f32 %v1562_v29, %v378_v24  ;;  %v564_v31 = vpop.f32.mrb[11].mxu0 }
 0x116   : > { %616 = vst [vmem:[#allocation4 + $0x40] sm:$0xff] %v600_v28  ;;  %v601_v32 = vadd.f32 %v564_v31, %v376_v27 }
 0x117   : > { %619 = vst [vmem:[#allocation4 + $0x58] sm:$0xff] %v603_v30  ;;  %v648_v33 = vpack.c.bf16 %v603_v30, %v602_v25 }
 0x118   : > { %617 = vst [vmem:[#allocation4 + $0x48] sm:$0xff] %v601_v32  ;;  %v647_v35 = vpack.c.bf16 %v601_v32, %v600_v28 }
 0x11a   : > { %v1565_v37 = vpop.f32.mrb[12].mxu0  ;;  %1591 = vmatprep.mubr.bf16.mxu1 %v647_v35 }
 0x11b   : > { %v606_v39 = vadd.f32 %v1565_v37, %v381_v34  ;;  %v577_v40 = vpop.f32.mrb[13].mxu0  ;;  %1592 = vmatmul.mubr.bf16.gmra.mrb[8].mxu1 %v648_v33 }
 0x11c   : > { %v604_v42 = vadd.f32 %v577_v40, %v379_v36  ;;  %v1566_v43 = vpop.f32.mrb[14].mxu0 }
 0x11d   : > { %622 = vst [vmem:[#allocation4 + $0x70] sm:$0xff] %v606_v39  ;;  %v607_v44 = vadd.f32 %v1566_v43, %v382_v38  ;;  %v580_v45 = vpop.f32.mrb[15].mxu0 }
 0x11e   : > { %620 = vst [vmem:[#allocation4 + $0x60] sm:$0xff] %v604_v42  ;;  %v605_v46 = vadd.f32 %v580_v45, %v380_v41 }
 0x11f   : > { %623 = vst [vmem:[#allocation4 + $0x78] sm:$0xff] %v607_v44  ;;  %v650_v47 = vpack.c.bf16 %v607_v44, %v606_v39 }
 0x120   : > { %621 = vst [vmem:[#allocation4 + $0x68] sm:$0xff] %v605_v46  ;;  %v649_v48 = vpack.c.bf16 %v605_v46, %v604_v42 }
 0x122   : > { %1595 = vmatprep.mubr.bf16.mxu1 %v649_v48 }
 0x123   : > { %1596 = vmatmul.mubr.bf16.gmra.mrb[12].mxu1 %v650_v47 }
 0x1de   : > { %v1585_v50 = vpop.f32.mrb[0].mxu1 }
 0x1df   : > { %v765_v51 = vadd.f32 %v1585_v50, %v1440_v49  ;;  %v756_v52 = vpop.f32.mrb[1].mxu1 }
 0x1e0   : > { %v757_v53 = vadd.f32 %v1440_v49, %v756_v52  ;;  %v1586_v54 = vpop.f32.mrb[2].mxu1 }
 0x1e1   : > { %v768_v55 = vadd.f32 %v1586_v54, %v1440_v49  ;;  %v759_v56 = vpop.f32.mrb[3].mxu1  ;;  %v821_v58 = vmax.f32 %v765_v51, 0.0 }
 0x1e2   : > { %v760_v57 = vadd.f32 %v1440_v49, %v759_v56  ;;  %v819_v60 = vmax.f32 %v757_v53, 0.0 }
 0x1e3   : > { %v822_v59 = vmax.f32 %v768_v55, 0.0 }
 0x1e4   : > { %v820_v61 = vmax.f32 %v760_v57, 0.0 }
 0x1e5   : > { %v837_v62 = vpack.c.bf16 %v822_v59, %v821_v58 }
 0x1e6   : > { %v836_v63 = vpack.c.bf16 %v820_v61, %v819_v60  ;;  %v1589_v2 = vpop.f32.mrb[4].mxu1 }
 0x1e7   : > { %849 = vst [vmem:[#allocation2 + $0x8] sm:$0xff] %v837_v62  ;;  %v781_v17 = vadd.f32 %v1589_v2, %v1440_v49  ;;  %v772_v18 = vpop.f32.mrb[5].mxu1 }
 0x1e8   : > { %848 = vst [vmem:[#allocation2] sm:$0xff] %v836_v63  ;;  %v773_v19 = vadd.f32 %v1440_v49, %v772_v18  ;;  %v1590_v20 = vpop.f32.mrb[6].mxu1 }
 0x1e9   : > { %v784_v21 = vadd.f32 %v1590_v20, %v1440_v49  ;;  %v775_v22 = vpop.f32.mrb[7].mxu1  ;;  %v825_v24 = vmax.f32 %v781_v17, 0.0 }
 0x1ea   : > { %v776_v23 = vadd.f32 %v1440_v49, %v775_v22  ;;  %v823_v26 = vmax.f32 %v773_v19, 0.0 }
 0x1eb   : > { %v826_v25 = vmax.f32 %v784_v21, 0.0 }
 0x1ec   : > { %v824_v27 = vmax.f32 %v776_v23, 0.0 }
 0x1ed   : > { %v839_v28 = vpack.c.bf16 %v826_v25, %v825_v24 }
 0x1ee   : > { %v838_v29 = vpack.c.bf16 %v824_v27, %v823_v26  ;;  %v1593_v30 = vpop.f32.mrb[8].mxu1 }
 0x1ef   : > { %851 = vst [vmem:[#allocation2 + $0x18] sm:$0xff] %v839_v28  ;;  %v797_v31 = vadd.f32 %v1593_v30, %v1440_v49  ;;  %v788_v32 = vpop.f32.mrb[9].mxu1 }
 0x1f0   : > { %850 = vst [vmem:[#allocation2 + $0x10] sm:$0xff] %v838_v29  ;;  %v789_v33 = vadd.f32 %v1440_v49, %v788_v32  ;;  %v1594_v34 = vpop.f32.mrb[10].mxu1 }
 0x1f1   : > { %v800_v35 = vadd.f32 %v1594_v34, %v1440_v49  ;;  %v791_v36 = vpop.f32.mrb[11].mxu1  ;;  %v829_v38 = vmax.f32 %v797_v31, 0.0 }
 0x1f2   : > { %v792_v37 = vadd.f32 %v1440_v49, %v791_v36  ;;  %v827_v40 = vmax.f32 %v789_v33, 0.0 }
 0x1f3   : > { %v830_v39 = vmax.f32 %v800_v35, 0.0 }
 0x1f4   : > { %v828_v41 = vmax.f32 %v792_v37, 0.0 }
 0x1f5   : > { %v841_v42 = vpack.c.bf16 %v830_v39, %v829_v38 }
 0x1f6   : > { %v840_v43 = vpack.c.bf16 %v828_v41, %v827_v40  ;;  %v1597_v44 = vpop.f32.mrb[12].mxu1 }
 0x1f7   : > { %853 = vst [vmem:[#allocation2 + $0x28] sm:$0xff] %v841_v42  ;;  %v813_v45 = vadd.f32 %v1597_v44, %v1440_v49  ;;  %v804_v46 = vpop.f32.mrb[13].mxu1 }
 0x1f8   : > { %852 = vst [vmem:[#allocation2 + $0x20] sm:$0xff] %v840_v43  ;;  %v805_v47 = vadd.f32 %v1440_v49, %v804_v46  ;;  %v1598_v48 = vpop.f32.mrb[14].mxu1 }
 0x1f9   : > { %v816_v50 = vadd.f32 %v1598_v48, %v1440_v49  ;;  %v807_v51 = vpop.f32.mrb[15].mxu1  ;;  %v833_v53 = vmax.f32 %v813_v45, 0.0 }
 0x1fa   : > { %v808_v52 = vadd.f32 %v1440_v49, %v807_v51  ;;  %v831_v55 = vmax.f32 %v805_v47, 0.0 }
 0x1fb   : > { %v834_v54 = vmax.f32 %v816_v50, 0.0 }
 0x1fc   : > { %v832_v56 = vmax.f32 %v808_v52, 0.0 }
 0x1fd   : > { %v843_v57 = vpack.c.bf16 %v834_v54, %v833_v53 }
 0x1fe   : > { %v842_v58 = vpack.c.bf16 %v832_v56, %v831_v55 }
 0x1ff   : > { %855 = vst [vmem:[#allocation2 + $0x38] sm:$0xff] %v843_v57 }
 0x200   : > { %854 = vst [vmem:[#allocation2 + $0x30] sm:$0xff] %v842_v58 }
 0x201 PF: > { %p1449_p5 = scmp.ne.s32.totalorder %s1726_s21, 1 }
 0x202   : > { %v1704_v59 = vld [vmem:[%s2063_s4] sm:$0xff] (!%p1449_p5)   ;;  %v1705_v49 = vld [vmem:[%s2063_s4 + $0x8] sm:$0xff] (!%p1449_p5)   ;;  %v1706_v60 = vld [vmem:[%s2063_s4 + $0x10] sm:$0xff] (!%p1449_p5)   ;;  %v1458_v26 = vcombine.low (!%p1449_p5), %v1795_v0, %v1800_v1  ;;  %v1459_v50 = vcombine.low (!%p1449_p5), %v1805_v3, %v1810_v4  ;;  %v1460_v51 = vcombine.low (!%p1449_p5), %v1815_v5, %v1820_v6  ;;  %v1461_v52 = vcombine.low (!%p1449_p5), %v1825_v7, %v1830_v8 }
 0x203   : > { %859 = sbr.rel (%p1449_p5) target bundleno = 1040 (0x410), region = 60  ;;  %1599 = vmatprep.subr.bf16.mxu0 (!%p1449_p5), %v1704_v59  ;;  %v1707_v61 = vld [vmem:[%s2063_s4 + $0x18] sm:$0xff] (!%p1449_p5)   ;;  %v869_v62 = vld [vmem:[#allocation2] sm:$0xff] (!%p1449_p5)  ;;  %v1708_v63 = vld [vmem:[%s2063_s4 + $0x20] sm:$0xff] (!%p1449_p5)   ;;  %v1462_v53 = vcombine.low (!%p1449_p5), %v1835_v9, %v1840_v10  ;;  %v1463_v54 = vcombine.low (!%p1449_p5), %v1845_v11, %v1850_v12  ;;  %v1464_v3 = vcombine.low (!%p1449_p5), %v1855_v13, %v1860_v14  ;;  %v1465_v4 = vcombine.low (!%p1449_p5), %v1865_v15, %v1870_v16 }
 0x204   : > { %1600 = vmatpush3.bf16.msra.mxu0 (!%p1449_p5), %v1704_v59  ;;  %1615 = vmatprep.mubr.bf16.mxu0 (!%p1449_p5), %v869_v62  ;;  %v1709_v2 = vld [vmem:[%s2063_s4 + $0x28] sm:$0xff] (!%p1449_p5)   ;;  %v1710_v17 = vld [vmem:[%s2063_s4 + $0x30] sm:$0xff] (!%p1449_p5)   ;;  %v1711_v18 = vld [vmem:[%s2063_s4 + $0x38] sm:$0xff] (!%p1449_p5)  }
 0x205   : > { %1601 = vmatprep.subr.bf16.mxu0 (!%p1449_p5), %v1705_v49  ;;  %v870_v19 = vld [vmem:[#allocation2 + $0x8] sm:$0xff] (!%p1449_p5)  ;;  %v871_v20 = vld [vmem:[#allocation2 + $0x10] sm:$0xff] (!%p1449_p5)  ;;  %v872_v21 = vld [vmem:[#allocation2 + $0x18] sm:$0xff] (!%p1449_p5)  ;;  %1647 = vmatprep.mubr.bf16.mxu1 (!%p1449_p5), %v1458_v26 }
 0x206   : > { %v873_v22 = vld [vmem:[#allocation2 + $0x20] sm:$0xff] (!%p1449_p5)  ;;  %v874_v23 = vld [vmem:[#allocation2 + $0x28] sm:$0xff] (!%p1449_p5)  ;;  %v876_v25 = vld [vmem:[#allocation2 + $0x38] sm:$0xff] (!%p1449_p5) }
 0x207   : > { %v875_v24 = vld [vmem:[#allocation2 + $0x30] sm:$0xff] (!%p1449_p5)  ;;  %v1068_v6 = vld [vmem:[#allocation4] sm:$0xff] (!%p1449_p5)  ;;  %v1071_v9 = vld [vmem:[#allocation4 + $0x18] sm:$0xff] (!%p1449_p5) }
 0x208   : > { %1602 = vmatpush3.bf16.msra.mxu0 (!%p1449_p5), %v1705_v49  ;;  %v1070_v5 = vld [vmem:[#allocation4 + $0x10] sm:$0xff] (!%p1449_p5)  ;;  %v1069_v12 = vld [vmem:[#allocation4 + $0x8] sm:$0xff] (!%p1449_p5)  ;;  %v1075_v62 = vld [vmem:[#allocation4 + $0x38] sm:$0xff] (!%p1449_p5) }
 0x209   : > { %1603 = vmatprep.subr.bf16.mxu0 (!%p1449_p5), %v1706_v60  ;;  %v1984_v8 = vld [vmem:[%s2064_s5] ss:$0 sm:$0xff] (!%p1449_p5) }
 0x20a   : > { %v1074_v49 = vld [vmem:[#allocation4 + $0x30] sm:$0xff] }
 0x20c   : > { %1604 = vmatpush3.bf16.msra.mxu0 %v1706_v60  ;;  %v1072_v60 = vld [vmem:[#allocation4 + $0x20] sm:$0xff] }
 0x20d   : > { %1605 = vmatprep.subr.bf16.mxu0 %v1707_v61 }
 0x210   : > { %1606 = vmatpush3.bf16.msra.mxu0 %v1707_v61 }
 0x211   : > { %1607 = vmatprep.subr.bf16.mxu0 %v1708_v63 }
 0x214   : > { %1608 = vmatpush3.bf16.msra.mxu0 %v1708_v63 }
 0x215   : > { %1609 = vmatprep.subr.bf16.mxu0 %v1709_v2 }
 0x218   : > { %1610 = vmatpush3.bf16.msra.mxu0 %v1709_v2 }
 0x219   : > { %1611 = vmatprep.subr.bf16.mxu0 %v1710_v17 }
 0x21c   : > { %1612 = vmatpush3.bf16.msra.mxu0 %v1710_v17  ;;  %v1073_v17 = vld [vmem:[#allocation4 + $0x28] sm:$0xff] }
 0x21d   : > { %1613 = vmatprep.subr.bf16.mxu0 %v1711_v18 }
 0x220   : > { %1614 = vmatpush3.bf16.msra.mxu0 %v1711_v18 }
 0x223   : > { %1616 = vmatmul.mubr.bf16.vlgmr.msra.gmra.mrb[0].mxu0 %v870_v19 }
 0x224   : > { %1619 = vmatprep.mubr.bf16.mxu0 %v871_v20 }
 0x22b   : > { %1620 = vmatmul.mubr.bf16.gmra.mrb[4].mxu0 %v872_v21 }
 0x22c   : > { %1623 = vmatprep.mubr.bf16.mxu0 %v873_v22 }
 0x233   : > { %1624 = vmatmul.mubr.bf16.gmra.mrb[8].mxu0 %v874_v23 }
 0x234   : > { %1627 = vmatprep.mubr.bf16.mxu0 %v875_v24 }
 0x23b   : > { %1628 = vmatmul.mubr.bf16.gmra.mrb[12].mxu0 %v876_v25 }
 0x2f6   : > { %v1617_v27 = vpop.f32.mrb[0].mxu0 }
 0x2f7   : > { %v975_v28 = vpop.f32.mrb[1].mxu0 }
 0x2f8   : > { %v1618_v29 = vpop.f32.mrb[2].mxu0 }
 0x2f9   : > { %v1039_v30 = vpack.c.bf16 %v1618_v29, %v1617_v27  ;;  %v978_v31 = vpop.f32.mrb[3].mxu0  ;;  %v1078_v27 = vld [vmem:[#allocation4 + $0x50] sm:$0xff] }
 0x2fa   : > { %v1038_v32 = vpack.c.bf16 %v978_v31, %v975_v28  ;;  %v1076_v28 = vld [vmem:[#allocation4 + $0x40] sm:$0xff] }
 0x2fc   : > { %1631 = vmatprep.subr.bf16.mxu1 %v1038_v32 }
 0x2fd   : > { %1632 = vmatpush3.bf16.msra.mxu1 %v1038_v32 }
 0x2fe   : > { %v1621_v33 = vpop.f32.mrb[4].mxu0  ;;  %1633 = vmatprep.subr.bf16.mxu1 %v1039_v30 }
 0x2ff   : > { %v991_v34 = vpop.f32.mrb[5].mxu0 }
 0x300   : > { %v1622_v35 = vpop.f32.mrb[6].mxu0 }
 0x301   : > { %v1041_v36 = vpack.c.bf16 %v1622_v35, %v1621_v33  ;;  %v994_v37 = vpop.f32.mrb[7].mxu0  ;;  %1634 = vmatpush3.bf16.msra.mxu1 %v1039_v30  ;;  %v1079_v30 = vld [vmem:[#allocation4 + $0x58] sm:$0xff]  ;;  %v1077_v33 = vld [vmem:[#allocation4 + $0x48] sm:$0xff] }
 0x302   : > { %v1040_v38 = vpack.c.bf16 %v994_v37, %v991_v34 }
 0x304   : > { %1635 = vmatprep.subr.bf16.mxu1 %v1040_v38 }
 0x305   : > { %1636 = vmatpush3.bf16.msra.mxu1 %v1040_v38 }
 0x306   : > { %v1625_v0 = vpop.f32.mrb[8].mxu0  ;;  %1637 = vmatprep.subr.bf16.mxu1 %v1041_v36 }
 0x307   : > { %v1007_v1 = vpop.f32.mrb[9].mxu0 }
 0x308   : > { %v1626_v39 = vpop.f32.mrb[10].mxu0 }
 0x309   : > { %v1043_v40 = vpack.c.bf16 %v1626_v39, %v1625_v0  ;;  %v1010_v41 = vpop.f32.mrb[11].mxu0  ;;  %1638 = vmatpush3.bf16.msra.mxu1 %v1041_v36 }
 0x30a   : > { %v1042_v42 = vpack.c.bf16 %v1010_v41, %v1007_v1  ;;  %v1082_v41 = vld [vmem:[#allocation4 + $0x70] sm:$0xff] }
 0x30c   : > { %1639 = vmatprep.subr.bf16.mxu1 %v1042_v42 }
 0x30d   : > { %1640 = vmatpush3.bf16.msra.mxu1 %v1042_v42  ;;  %v1080_v42 = vld [vmem:[#allocation4 + $0x60] sm:$0xff] }
 0x30e   : > { %v1629_v43 = vpop.f32.mrb[12].mxu0  ;;  %1641 = vmatprep.subr.bf16.mxu1 %v1043_v40 }
 0x30f   : > { %v1023_v44 = vpop.f32.mrb[13].mxu0 }
 0x310   : > { %v1630_v45 = vpop.f32.mrb[14].mxu0 }
 0x311   : > { %v1045_v46 = vpack.c.bf16 %v1630_v45, %v1629_v43  ;;  %v1026_v47 = vpop.f32.mrb[15].mxu0  ;;  %1642 = vmatpush3.bf16.msra.mxu1 %v1043_v40 }
 0x312   : > { %v1044_v48 = vpack.c.bf16 %v1026_v47, %v1023_v44  ;;  %v1083_v44 = vld [vmem:[#allocation4 + $0x78] sm:$0xff]  ;;  %v1081_v47 = vld [vmem:[#allocation4 + $0x68] sm:$0xff] }
 0x314   : > { %1643 = vmatprep.subr.bf16.mxu1 %v1044_v48 }
 0x315   : > { %1644 = vmatpush3.bf16.msra.mxu1 %v1044_v48 }
 0x316   : > { %1645 = vmatprep.subr.bf16.mxu1 %v1045_v46 }
 0x319   : > { %1646 = vmatpush3.bf16.msra.mxu1 %v1045_v46 }
 0x31c   : > { %1648 = vmatmul.mubr.bf16.vlgmr.msra.gmra.mrb[0].mxu1 %v1459_v50 }
 0x31d   : > { %1651 = vmatprep.mubr.bf16.mxu1 %v1460_v51 }
 0x324   : > { %1652 = vmatmul.mubr.bf16.gmra.mrb[4].mxu1 %v1461_v52 }
 0x325   : > { %1655 = vmatprep.mubr.bf16.mxu1 %v1462_v53 }
 0x32c   : > { %1656 = vmatmul.mubr.bf16.gmra.mrb[8].mxu1 %v1463_v54 }
 0x32d   : > { %1659 = vmatprep.mubr.bf16.mxu1 %v1464_v3 }
 0x334   : > { %1660 = vmatmul.mubr.bf16.gmra.mrb[12].mxu1 %v1465_v4 }
 0x3ef   : > { %v1649_v7 = vpop.f32.mrb[0].mxu1 }
 0x3f0   : > { %v1231_v10 = vadd.f32 %v1649_v7, %v1070_v5  ;;  %v1166_v11 = vpop.f32.mrb[1].mxu1 }
 0x3f1   : > { %v1229_v55 = vadd.f32 %v1166_v11, %v1068_v6  ;;  %v1650_v13 = vpop.f32.mrb[2].mxu1 }
 0x3f2   : > { %1247 = vst [vmem:[#allocation4 + $0x10] sm:$0xff] %v1231_v10  ;;  %v1289_v14 = vadd.f32 %v1984_v8, %v1231_v10  ;;  %v1232_v56 = vadd.f32 %v1650_v13, %v1071_v9  ;;  %v1169_v15 = vpop.f32.mrb[3].mxu1 }
 0x3f3   : > { %1245 = vst [vmem:[#allocation4] sm:$0xff] %v1229_v55  ;;  %v1287_v16 = vadd.f32 %v1984_v8, %v1229_v55  ;;  %v1230_v57 = vadd.f32 %v1169_v15, %v1069_v12 }
 0x3f4   : > { %1305 = vst [vmem:[%s2065_s6 + $0x10] sm:$0xff] %v1289_v14  ;;  %1248 = vst [vmem:[#allocation4 + $0x18] sm:$0xff] %v1232_v56  ;;  %v1290_v58 = vadd.f32 %v1984_v8, %v1232_v56 }
 0x3f5   : > { %1303 = vst [vmem:[%s2065_s6] sm:$0xff] %v1287_v16  ;;  %1246 = vst [vmem:[#allocation4 + $0x8] sm:$0xff] %v1230_v57  ;;  %v1288_v59 = vadd.f32 %v1984_v8, %v1230_v57 }
 0x3f6   : > { %1306 = vst [vmem:[%s2065_s6 + $0x18] sm:$0xff] %v1290_v58 }
 0x3f7   : > { %1304 = vst [vmem:[%s2065_s6 + $0x8] sm:$0xff] %v1288_v59  ;;  %v1653_v61 = vpop.f32.mrb[4].mxu1 }
 0x3f8   : > { %v1235_v63 = vadd.f32 %v1653_v61, %v1074_v49  ;;  %v1182_v2 = vpop.f32.mrb[5].mxu1 }
 0x3f9   : > { %v1233_v18 = vadd.f32 %v1182_v2, %v1072_v60  ;;  %v1654_v19 = vpop.f32.mrb[6].mxu1 }
 0x3fa   : > { %1251 = vst [vmem:[#allocation4 + $0x30] sm:$0xff] %v1235_v63  ;;  %v1293_v20 = vadd.f32 %v1984_v8, %v1235_v63  ;;  %v1236_v21 = vadd.f32 %v1654_v19, %v1075_v62  ;;  %v1185_v22 = vpop.f32.mrb[7].mxu1 }
 0x3fb   : > { %1249 = vst [vmem:[#allocation4 + $0x20] sm:$0xff] %v1233_v18  ;;  %v1291_v23 = vadd.f32 %v1984_v8, %v1233_v18  ;;  %v1234_v24 = vadd.f32 %v1185_v22, %v1073_v17 }
 0x3fc   : > { %1309 = vst [vmem:[%s2065_s6 + $0x30] sm:$0xff] %v1293_v20  ;;  %1252 = vst [vmem:[#allocation4 + $0x38] sm:$0xff] %v1236_v21  ;;  %v1294_v25 = vadd.f32 %v1984_v8, %v1236_v21 }
 0x3fd   : > { %1307 = vst [vmem:[%s2065_s6 + $0x20] sm:$0xff] %v1291_v23  ;;  %1250 = vst [vmem:[#allocation4 + $0x28] sm:$0xff] %v1234_v24  ;;  %v1292_v26 = vadd.f32 %v1984_v8, %v1234_v24 }
 0x3fe   : > { %1310 = vst [vmem:[%s2065_s6 + $0x38] sm:$0xff] %v1294_v25 }
 0x3ff   : > { %1308 = vst [vmem:[%s2065_s6 + $0x28] sm:$0xff] %v1292_v26  ;;  %v1657_v29 = vpop.f32.mrb[8].mxu1 }
 0x400   : > { %v1239_v31 = vadd.f32 %v1657_v29, %v1078_v27  ;;  %v1198_v32 = vpop.f32.mrb[9].mxu1 }
 0x401   : > { %v1237_v34 = vadd.f32 %v1198_v32, %v1076_v28  ;;  %v1658_v35 = vpop.f32.mrb[10].mxu1 }
 0x402   : > { %1255 = vst [vmem:[#allocation4 + $0x50] sm:$0xff] %v1239_v31  ;;  %v1297_v36 = vadd.f32 %v1984_v8, %v1239_v31  ;;  %v1240_v37 = vadd.f32 %v1658_v35, %v1079_v30  ;;  %v1201_v38 = vpop.f32.mrb[11].mxu1 }
 0x403   : > { %1253 = vst [vmem:[#allocation4 + $0x40] sm:$0xff] %v1237_v34  ;;  %v1295_v0 = vadd.f32 %v1984_v8, %v1237_v34  ;;  %v1238_v1 = vadd.f32 %v1201_v38, %v1077_v33 }
 0x404   : > { %1313 = vst [vmem:[%s2065_s6 + $0x50] sm:$0xff] %v1297_v36  ;;  %1256 = vst [vmem:[#allocation4 + $0x58] sm:$0xff] %v1240_v37  ;;  %v1298_v39 = vadd.f32 %v1984_v8, %v1240_v37 }
 0x405   : > { %1311 = vst [vmem:[%s2065_s6 + $0x40] sm:$0xff] %v1295_v0  ;;  %1254 = vst [vmem:[#allocation4 + $0x48] sm:$0xff] %v1238_v1  ;;  %v1296_v40 = vadd.f32 %v1984_v8, %v1238_v1 }
 0x406   : > { %1314 = vst [vmem:[%s2065_s6 + $0x58] sm:$0xff] %v1298_v39 }
 0x407   : > { %1312 = vst [vmem:[%s2065_s6 + $0x48] sm:$0xff] %v1296_v40  ;;  %v1661_v43 = vpop.f32.mrb[12].mxu1 }
 0x408   : > { %v1243_v45 = vadd.f32 %v1661_v43, %v1082_v41  ;;  %v1214_v46 = vpop.f32.mrb[13].mxu1 }
 0x409   : > { %v1241_v48 = vadd.f32 %v1214_v46, %v1080_v42  ;;  %v1662_v50 = vpop.f32.mrb[14].mxu1 }
 0x40a   : > { %1259 = vst [vmem:[#allocation4 + $0x70] sm:$0xff] %v1243_v45  ;;  %v1301_v51 = vadd.f32 %v1984_v8, %v1243_v45  ;;  %v1244_v52 = vadd.f32 %v1662_v50, %v1083_v44  ;;  %v1217_v53 = vpop.f32.mrb[15].mxu1 }
 0x40b   : > { %1257 = vst [vmem:[#allocation4 + $0x60] sm:$0xff] %v1241_v48  ;;  %v1299_v54 = vadd.f32 %v1984_v8, %v1241_v48  ;;  %v1242_v3 = vadd.f32 %v1217_v53, %v1081_v47 }
 0x40c   : > { %1317 = vst [vmem:[%s2065_s6 + $0x70] sm:$0xff] %v1301_v51  ;;  %1260 = vst [vmem:[#allocation4 + $0x78] sm:$0xff] %v1244_v52  ;;  %v1302_v4 = vadd.f32 %v1984_v8, %v1244_v52 }
 0x40d   : > { %1315 = vst [vmem:[%s2065_s6 + $0x60] sm:$0xff] %v1299_v54  ;;  %1258 = vst [vmem:[#allocation4 + $0x68] sm:$0xff] %v1242_v3  ;;  %v1300_v5 = vadd.f32 %v1984_v8, %v1242_v3 }
 0x40e   : > { %1318 = vst [vmem:[%s2065_s6 + $0x78] sm:$0xff] %v1302_v4 }
 0x40f   : > { %1316 = vst [vmem:[%s2065_s6 + $0x68] sm:$0xff] %v1300_v5 }
 0x410 PF: > { %s16_s23 = sadd.s32 1, %s1734_s23   ;;  %s2066_s21 = smov %s1730_s22 }
 0x411   : > { %p13_p6 = scmp.ge.s32.totalorder %s16_s23, 4   ;;  %s2067_s22 = smov %s2069_s24 }
 0x413   :  { %15 = sbr.rel (!%p13_p6) target bundleno = 2 (0x2), region = 105 }

</bundles_post_ra>
